<compile_context>
chip_gen: v7x
topology: tpu7x:2x2x1
jax: 0.10.0
libtpu: 0.0.40
codegen_flags: <defaults>
</compile_context>

<pallas_src>
import functools

import jax
import jax.numpy as jnp
from jax.experimental import pallas as pl
from jax.experimental.pallas import tpu as pltpu

LANE = 128
SUBLANE = 8
# Keep per-step VMEM comfortably under v5e's 16 MiB scoped-VMEM default so we
# never need to raise vmem_limit_bytes (v6e/v7x scoped defaults are larger).
VMEM_BUDGET_BYTES = 12 << 20
# Below this batch, splitting the grid just so v7x's second TensorCore has
# work costs more in padding / per-step overhead than it saves.
MEGACORE_MIN_BATCH = 1024


def _round_up(n, m):
    return ((n + m - 1) // m) * m


def _cdiv(a, b):
    return (a + b - 1) // b


def dqn_kernel(x_ref, w1_ref, b1_ref, w2_ref, b2_ref, w3_ref, b3_ref, o_ref):
    # layer1 + ReLU  (K = maze_size, N = 128 padded hidden)
    h1 = jnp.dot(x_ref[...], w1_ref[...], preferred_element_type=jnp.float32)
    h1 = jnp.maximum(h1 + b1_ref[...], 0.0)
    # layer2 + ReLU  (128 x 128)
    h2 = jnp.dot(h1, w2_ref[...], preferred_element_type=jnp.float32)
    h2 = jnp.maximum(h2 + b2_ref[...], 0.0)
    # output layer: slim (128 x op) matmul, op = num_actions rounded to 8
    out = jnp.dot(h2, w3_ref[...], preferred_element_type=jnp.float32)
    o_ref[...] = out + b3_ref[...]


def pad_params(params):
    """Zero-pad the hidden dim to 128 lanes and num_actions to 8.

    Zero padding keeps the math exact: padded hidden columns are
    relu(0 + 0) = 0 and padded weight rows/output columns are zero, so
    nothing leaks into the real Q-value columns (which the wrapper slices).
    """
    maze_size, hidden = params["w1"].shape
    num_actions = params["w3"].shape[1]
    hp = _round_up(hidden, LANE)          # 32 -> 128
    op = _round_up(num_actions, SUBLANE)  # 4  -> 8  (NOT 128: saves HBM writeback)

    def pad2(a, rows, cols):
        return jnp.pad(a, ((0, rows - a.shape[0]), (0, cols - a.shape[1])))

    return {
        "w1": pad2(params["w1"], maze_size, hp),
        "b1": pad2(params["b1"], 1, hp),
        "w2": pad2(params["w2"], hp, hp),
        "b2": pad2(params["b2"], 1, hp),
        "w3": pad2(params["w3"], hp, op),
        "b3": pad2(params["b3"], 1, op),
    }


def _choose_batch_tile(batch, block_batch, maze_size, hp, op):
    """Pick (tb, padded_batch): even TC split, minimal padding, VMEM-safe."""
    n_steps = _cdiv(batch, block_batch)
    # v7x megacore: give both TensorCores work when the batch is big enough.
    if batch >= MEGACORE_MIN_BATCH:
        n_steps = max(n_steps, 2)
    # An odd step count > 1 leaves one v7x TC idle for the tail step.
    if n_steps > 1 and n_steps % 2 == 1:
        n_steps += 1
    # Spread rows evenly across steps -> minimal batch padding
    # (e.g. batch=2500: 4 tiles of 632 -> pad to 2528, not 3x1024 -> 3072).
    tb = _round_up(_cdiv(batch, n_steps), SUBLANE)

    # Rough per-step VMEM: double-buffered x/out tiles + f32 intermediates
    # (h1, h2, pre-bias out) + double-buffered resident weights.
    weights_bytes = 8 * (maze_size * hp + hp + hp * hp + hp + hp * op + op)
    bytes_per_row = 4 * (2 * maze_size + 2 * hp + 3 * op)
    tb_cap = (VMEM_BUDGET_BYTES - weights_bytes) // bytes_per_row
    tb_cap = max(SUBLANE, (tb_cap // SUBLANE) * SUBLANE)
    tb = min(tb, tb_cap)

    padded_batch = _round_up(batch, tb)
    return tb, padded_batch


@functools.partial(jax.jit, static_argnames=("num_actions", "block_batch"))
def dqn_forward(x, padded_params, *, num_actions, block_batch=4096):
    """Run the fused DQN MLP on TPU via Pallas.

    x:             (batch, maze_size) float32
    padded_params: output of pad_params()
    returns:       (batch, num_actions) float32
    """
    batch, maze_size = x.shape
    p = padded_params
    hp = p["w1"].shape[1]   # padded hidden (128)
    op = p["w3"].shape[1]   # padded num_actions (8)

    tb, padded_batch = _choose_batch_tile(batch, block_batch, maze_size, hp, op)
    if padded_batch != batch:
        x = jnp.pad(x, ((0, padded_batch - batch), (0, 0)))
    grid = (padded_batch // tb,)

    # Advisory cost hint (bytes reflect the slim op-lane output).
    flops = 2 * padded_batch * (maze_size * hp + hp * hp + hp * op)
    bytes_accessed = 4 * (
        padded_batch * (maze_size + op)
        + maze_size * hp + hp * hp + hp * op + 2 * hp + op
    )
    cost = pl.CostEstimate(
        flops=flops, transcendentals=0, bytes_accessed=bytes_accessed
    )

    def resident(arr):
        # Full-array block, same block index every grid step -> weights and
        # biases stay resident in VMEM across the batch loop.
        return pl.BlockSpec(arr.shape, lambda i: (0, 0))

    out = pl.pallas_call(
        dqn_kernel,
        out_shape=jax.ShapeDtypeStruct((padded_batch, op), jnp.float32),
        grid=grid,
        in_specs=[
            pl.BlockSpec((tb, maze_size), lambda i: (i, 0)),
            resident(p["w1"]),
            resident(p["b1"]),
            resident(p["w2"]),
            resident(p["b2"]),
            resident(p["w3"]),
            resident(p["b3"]),
        ],
        out_specs=pl.BlockSpec((tb, op), lambda i: (i, 0)),
        compiler_params=pltpu.CompilerParams(
            dimension_semantics=("parallel",),
        ),
        cost_estimate=cost,
    )(x, p["w1"], p["b1"], p["w2"], p["b2"], p["w3"], p["b3"])

    # Slice away batch padding and the zero-padded Q-value lanes.
    return out[:batch, :num_actions]


def init_params(key, maze_size, hidden, num_actions):
    """Deterministic synthetic init (PyTorch-like uniform fan-in scaling)."""
    ks = jax.random.split(key, 6)

    def lin(kw, kb, fan_in, fan_out):
        bound = 1.0 / jnp.sqrt(fan_in)
        # stored as (in, out) == PyTorch weight (out, in) transposed
        w = jax.random.uniform(kw, (fan_in, fan_out), jnp.float32, -bound, bound)
        b = jax.random.uniform(kb, (1, fan_out), jnp.float32, -bound, bound)
        return w, b

    w1, b1 = lin(ks[0], ks[1], maze_size, hidden)
    w2, b2 = lin(ks[2], ks[3], hidden, hidden)
    w3, b3 = lin(ks[4], ks[5], hidden, num_actions)
    return {"w1": w1, "b1": b1, "w2": w2, "b2": b2, "w3": w3, "b3": b3}


def dqn_reference(x, p):
    h1 = jnp.maximum(x @ p["w1"] + p["b1"], 0.0)
    h2 = jnp.maximum(h1 @ p["w2"] + p["b2"], 0.0)
    return h2 @ p["w3"] + p["b3"]


if __name__ == "__main__":
    # maze_size = flattened maze (8x8 grid -> 64), num_actions = 4
    batch, maze_size, hidden, num_actions = 8, 64, 32, 4

    key = jax.random.PRNGKey(0)
    kx, kp = jax.random.split(key)
    x = jax.random.normal(kx, (batch, maze_size), dtype=jnp.float32)
    params = init_params(kp, maze_size, hidden, num_actions)
    padded = pad_params(params)

    out = dqn_forward(x, padded, num_actions=num_actions)
    out = jax.block_until_ready(out)

    ref = dqn_reference(x, params)
    assert out.shape == (batch, num_actions)
    assert jnp.allclose(out, ref, atol=1e-5, rtol=1e-5), "mismatch vs reference"

    # Larger, non-tile-multiple batch (replay/training path): exercises the
    # even-split / minimal-padding tile selection (2500 -> 2 tiles of 1256).
    big_batch = 2500
    xb = jax.random.normal(jax.random.PRNGKey(1), (big_batch, maze_size),
                           dtype=jnp.float32)
    out_b = jax.block_until_ready(
        dqn_forward(xb, padded, num_actions=num_actions))
    ref_b = dqn_reference(xb, params)
    assert out_b.shape == (big_batch, num_actions)
    assert jnp.allclose(out_b, ref_b, atol=1e-4, rtol=1e-4), "mismatch (big batch)"

    print("KERNEL_OK")
</pallas_src>

<mosaic_0001>
module attributes {stable_mosaic.version = 11 : i64} {
  func.func @dqn_kernel(%arg0: i32, %arg1: memref<8x64xf32, #tpu.memory_space<vmem>>, %arg2: memref<64x128xf32, #tpu.memory_space<vmem>>, %arg3: memref<1x128xf32, #tpu.memory_space<vmem>>, %arg4: memref<128x128xf32, #tpu.memory_space<vmem>>, %arg5: memref<1x128xf32, #tpu.memory_space<vmem>>, %arg6: memref<128x8xf32, #tpu.memory_space<vmem>>, %arg7: memref<1x8xf32, #tpu.memory_space<vmem>>, %arg8: memref<8x8xf32, #tpu.memory_space<vmem>>) attributes {dimension_semantics = [#tpu.dimension_semantics<parallel>], iteration_bounds = array<i64: 1>, scalar_prefetch = 0 : i64, scratch_operands = 0 : i64, tpu.core_type = #tpu.core_type<tc>, window_params = [{transform_indices = @transform_0, window_bounds = array<i64: 8, 64>}, {pipeline_mode = #tpu.pipeline_mode<synchronous>, transform_indices = @transform_1, window_bounds = array<i64: 64, 128>}, {pipeline_mode = #tpu.pipeline_mode<synchronous>, transform_indices = @transform_2, window_bounds = array<i64: 1, 128>}, {pipeline_mode = #tpu.pipeline_mode<synchronous>, transform_indices = @transform_3, window_bounds = array<i64: 128, 128>}, {pipeline_mode = #tpu.pipeline_mode<synchronous>, transform_indices = @transform_4, window_bounds = array<i64: 1, 128>}, {pipeline_mode = #tpu.pipeline_mode<synchronous>, transform_indices = @transform_5, window_bounds = array<i64: 128, 8>}, {pipeline_mode = #tpu.pipeline_mode<synchronous>, transform_indices = @transform_6, window_bounds = array<i64: 1, 8>}, {transform_indices = @transform_7, window_bounds = array<i64: 8, 8>}]} {
    %c0 = arith.constant 0 : index
    %c0_0 = arith.constant 0 : index
    %0 = vector.load %arg1[%c0, %c0_0] : memref<8x64xf32, #tpu.memory_space<vmem>>, vector<8x64xf32>
    %c0_1 = arith.constant 0 : index
    %c0_2 = arith.constant 0 : index
    %1 = vector.load %arg2[%c0_1, %c0_2] : memref<64x128xf32, #tpu.memory_space<vmem>>, vector<64x128xf32>
    %cst = arith.constant dense<0.000000e+00> : vector<8x128xf32>
    %2 = tpu.matmul %0, %1, %cst {dimension_numbers = #tpu.dot_dimension_numbers<[1], [0], [0], [1], [0, 0, 1, 1], [], []>} : vector<8x64xf32>, vector<64x128xf32>, vector<8x128xf32> -> vector<8x128xf32>
    %c0_3 = arith.constant 0 : index
    %c0_4 = arith.constant 0 : index
    %3 = vector.load %arg3[%c0_3, %c0_4] : memref<1x128xf32, #tpu.memory_space<vmem>>, vector<1x128xf32>
    %4 = vector.broadcast %3 : vector<1x128xf32> to vector<8x128xf32>
    %5 = arith.addf %2, %4 : vector<8x128xf32>
    %cst_5 = arith.constant 0.000000e+00 : f32
    %6 = vector.broadcast %cst_5 : f32 to vector<8x128xf32>
    %7 = arith.maximumf %5, %6 : vector<8x128xf32>
    %c0_6 = arith.constant 0 : index
    %c0_7 = arith.constant 0 : index
    %8 = vector.load %arg4[%c0_6, %c0_7] : memref<128x128xf32, #tpu.memory_space<vmem>>, vector<128x128xf32>
    %cst_8 = arith.constant dense<0.000000e+00> : vector<8x128xf32>
    %9 = tpu.matmul %7, %8, %cst_8 {dimension_numbers = #tpu.dot_dimension_numbers<[1], [0], [0], [1], [0, 0, 1, 1], [], []>} : vector<8x128xf32>, vector<128x128xf32>, vector<8x128xf32> -> vector<8x128xf32>
    %c0_9 = arith.constant 0 : index
    %c0_10 = arith.constant 0 : index
    %10 = vector.load %arg5[%c0_9, %c0_10] : memref<1x128xf32, #tpu.memory_space<vmem>>, vector<1x128xf32>
    %11 = vector.broadcast %10 : vector<1x128xf32> to vector<8x128xf32>
    %12 = arith.addf %9, %11 : vector<8x128xf32>
    %cst_11 = arith.constant 0.000000e+00 : f32
    %13 = vector.broadcast %cst_11 : f32 to vector<8x128xf32>
    %14 = arith.maximumf %12, %13 : vector<8x128xf32>
    %c0_12 = arith.constant 0 : index
    %c0_13 = arith.constant 0 : index
    %15 = vector.load %arg6[%c0_12, %c0_13] : memref<128x8xf32, #tpu.memory_space<vmem>>, vector<128x8xf32>
    %cst_14 = arith.constant dense<0.000000e+00> : vector<8x8xf32>
    %16 = tpu.matmul %14, %15, %cst_14 {dimension_numbers = #tpu.dot_dimension_numbers<[1], [0], [0], [1], [0, 0, 1, 1], [], []>} : vector<8x128xf32>, vector<128x8xf32>, vector<8x8xf32> -> vector<8x8xf32>
    %c0_15 = arith.constant 0 : index
    %c0_16 = arith.constant 0 : index
    %17 = vector.load %arg7[%c0_15, %c0_16] : memref<1x8xf32, #tpu.memory_space<vmem>>, vector<1x8xf32>
    %18 = vector.broadcast %17 : vector<1x8xf32> to vector<8x8xf32>
    %19 = arith.addf %16, %18 : vector<8x8xf32>
    %c0_17 = arith.constant 0 : index
    %c0_18 = arith.constant 0 : index
    %20 = vector.load %arg8[%c0_17, %c0_18] : memref<8x8xf32, #tpu.memory_space<vmem>>, vector<8x8xf32>
    tpu.vector_store %arg8[%c0_17, %c0_18], %19 {strides = array<i32>} : memref<8x8xf32, #tpu.memory_space<vmem>>, vector<8x8xf32>,
    return
  }
  func.func @transform_0(%arg0: i32) -> (i32, i32) {
    %c0_i32 = arith.constant 0 : i32
    %c0_i32_0 = arith.constant 0 : i32
    return %arg0, %c0_i32 : i32, i32
  }
  func.func @transform_1(%arg0: i32) -> (i32, i32) {
    %c0_i32 = arith.constant 0 : i32
    %c0_i32_0 = arith.constant 0 : i32
    %c0_i32_1 = arith.constant 0 : i32
    return %c0_i32, %c0_i32_0 : i32, i32
  }
  func.func @transform_2(%arg0: i32) -> (i32, i32) {
    %c0_i32 = arith.constant 0 : i32
    %c0_i32_0 = arith.constant 0 : i32
    %c0_i32_1 = arith.constant 0 : i32
    return %c0_i32, %c0_i32_0 : i32, i32
  }
  func.func @transform_3(%arg0: i32) -> (i32, i32) {
    %c0_i32 = arith.constant 0 : i32
    %c0_i32_0 = arith.constant 0 : i32
    %c0_i32_1 = arith.constant 0 : i32
    return %c0_i32, %c0_i32_0 : i32, i32
  }
  func.func @transform_4(%arg0: i32) -> (i32, i32) {
    %c0_i32 = arith.constant 0 : i32
    %c0_i32_0 = arith.constant 0 : i32
    %c0_i32_1 = arith.constant 0 : i32
    return %c0_i32, %c0_i32_0 : i32, i32
  }
  func.func @transform_5(%arg0: i32) -> (i32, i32) {
    %c0_i32 = arith.constant 0 : i32
    %c0_i32_0 = arith.constant 0 : i32
    %c0_i32_1 = arith.constant 0 : i32
    return %c0_i32, %c0_i32_0 : i32, i32
  }
  func.func @transform_6(%arg0: i32) -> (i32, i32) {
    %c0_i32 = arith.constant 0 : i32
    %c0_i32_0 = arith.constant 0 : i32
    %c0_i32_1 = arith.constant 0 : i32
    return %c0_i32, %c0_i32_0 : i32, i32
  }
  func.func @transform_7(%arg0: i32) -> (i32, i32) {
    %c0_i32 = arith.constant 0 : i32
    %c0_i32_0 = arith.constant 0 : i32
    return %arg0, %c0_i32 : i32, i32
  }
}

</mosaic_0001>

<bundles_post_ra>
// kernel: dqn_forward.1
= control target key start
LH: loop header
LB: loop body
LE: loop exit
PB: predicated region body
PF: predicated region fallthrough
CT: control target
= control target key end

     0   :  { %12 = vsyncpa [#allocation3], 0  ;;  %s551_s24 = smov [#allocation2]   ;;  %s743_s0 = inlined_call_operand.vmem [shape: f32[8,64], index: 0, kind: input, shape index: {}]   ;;  %s744_s1 = inlined_call_operand.hbm [shape: f32[64,128], index: 1, kind: input, shape index: {}]   ;;  %s745_s2 = inlined_call_operand.vmem [shape: f32[1,128], index: 2, kind: input, shape index: {}]   ;;  %s746_s3 = inlined_call_operand.vmem [shape: f32[128,128], index: 3, kind: input, shape index: {}]   ;;  %s747_s4 = inlined_call_operand.vmem [shape: f32[1,128], index: 4, kind: input, shape index: {}]   ;;  %s748_s5 = inlined_call_operand.vmem [shape: f32[128,8], index: 5, kind: input, shape index: {}]   ;;  %s749_s6 = inlined_call_operand.vmem [shape: f32[1,8], index: 6, kind: input, shape index: {}]   ;;  %s750_s7 = inlined_call_operand.vmem [shape: f32[8,8], index: 7, kind: output, shape index: {}]  }
   0x1   :  { %s20_s25 = sshll.u32 %s551_s24, 4  ;;  %s527_s28 = scalar_lea.hbm %s744_s1, 1024  ;;  %s21_s25 = int_to_ptr.vmem [resolvable:$true] %s20_s25 }
   0x2   :  { %p528_p0 = scmp.ne.s32.totalorder %s744_s1, %s527_s28  ;;  %p531_p1 = scmp.lt.u32.totalorder %s527_s28, %s744_s1 }
   0x4   :  { %p533_p2 = pnand %p531_p1, %p528_p0 }
   0x6   :  { %536 = shalt.err (!%p533_p2)
}
   0x7   :  { %s537_s10 = scalar_lea.vmem %s21_s25, 1024  ;;  %p542_p4 = scmp.lt.s32.totalorder %s21_s25, %s21_s25 }
   0x8   :  { %p538_p3 = scmp.ne.s32.totalorder %s21_s25, %s537_s10  ;;  %p543_p5 = scmp.lt.s32.totalorder %s537_s10, %s537_s10 }
   0xa   :  { %p544_p6 = por %p543_p5, %p542_p4 }
   0xc   :  { %p545_p7 = pnand %p544_p6, %p538_p3 }
   0xe   :  { %548 = shalt.err (!%p545_p7)
}
   0xf   :  { %s552_s11 = smov 128   ;;  %s553_s12 = smov 8  }
  0x10   :  { %26 = dma.hbm_to_vmem [thread:$0]  %s744_s1, 1024, %s21_s25, [#allocation3], %s552_s11, %s552_s11, %s553_s12  }
  0x11   :  { %549 = dma.done.wait [#allocation3], 1024  }
  0x12   :  { %550 = vsyncadd [#allocation3], 4294966272  ;;  %v554_v0 = vmov 0.0|0.0   ;;  %vm555_vm0 = vmmov 0   ;;  %v556_v1 = vmov 0.0   ;;  %v41_v2 = vld [vmem:[#allocation2] sm:$0xff] }
  0x13   :  { %461 = vmatprep.subr.bf16.mxu0 %v554_v0  ;;  %388 = vmatprep.mubr.msk.f32.mxu0 %vm555_vm0, %v556_v1  ;;  %v42_v3 = vld [vmem:[#allocation2 + $0x8] sm:$0xff]  ;;  %v43_v4 = vld [vmem:[#allocation2 + $0x10] sm:$0xff]  ;;  %v44_v6 = vld [vmem:[#allocation2 + $0x18] sm:$0xff]  ;;  %vm56_vm1 = vcmask 523264   ;;  %vm318_vm2 = vcmask 64512  }
  0x14   :  { %473 = vmatprep.subr.bf16.mxu1 %v554_v0  ;;  %423 = vmatprep.mubr.msk.f32.mxu1 %vm555_vm0, %v556_v1  ;;  %v462_v5 = vpack.c.bf16 %v42_v3, %v41_v2  ;;  %v465_v7 = vpack.c.bf16 %v44_v6, %v43_v4  ;;  %v131_v8 = vld [vmem:[%s746_s3] sm:$0xff]  ;;  %v132_v9 = vld [vmem:[%s746_s3 + $0x8] sm:$0xff]  ;;  %v133_v10 = vld [vmem:[%s746_s3 + $0x10] sm:$0xff] }
  0x15   :  { %v45_v11 = vld [vmem:[#allocation2 + $0x20] sm:$0xff]  ;;  %v46_v12 = vld [vmem:[#allocation2 + $0x28] sm:$0xff]  ;;  %v474_v13 = vpack.c.bf16 %v132_v9, %v131_v8  ;;  %v134_v14 = vld [vmem:[%s746_s3 + $0x18] sm:$0xff] }
  0x16   :  { %463 = vmatpush3.bf16.msra.mxu0 %v462_v5  ;;  %v477_v15 = vpack.c.bf16 %v134_v14, %v133_v10  ;;  %v468_v16 = vpack.c.bf16 %v46_v12, %v45_v11  ;;  %v135_v17 = vld [vmem:[%s746_s3 + $0x20] sm:$0xff]  ;;  %v136_v18 = vld [vmem:[%s746_s3 + $0x28] sm:$0xff]  ;;  %v47_v19 = vld [vmem:[#allocation2 + $0x30] sm:$0xff] }
  0x17   :  { %464 = vmatprep.subr.bf16.mxu0 %v554_v0  ;;  %475 = vmatpush3.bf16.msra.mxu1 %v474_v13  ;;  %v48_v20 = vld [vmem:[#allocation2 + $0x38] sm:$0xff]  ;;  %v480_v21 = vpack.c.bf16 %v136_v18, %v135_v17  ;;  %v137_v23 = vld [vmem:[%s746_s3 + $0x30] sm:$0xff]  ;;  %v40_v26 = vld [vmem:[%s743_s0] sm:$0xff] }
  0x18   :  { %476 = vmatprep.subr.bf16.mxu1 %v554_v0  ;;  %v471_v22 = vpack.c.bf16 %v48_v20, %v47_v19  ;;  %v138_v24 = vld [vmem:[%s746_s3 + $0x38] sm:$0xff]  ;;  %v139_v27 = vld [vmem:[%s746_s3 + $0x40] sm:$0xff]  ;;  %v140_v28 = vld [vmem:[%s746_s3 + $0x48] sm:$0xff] }
  0x19   :  { %v483_v25 = vpack.c.bf16 %v138_v24, %v137_v23  ;;  %v486_v29 = vpack.c.bf16 %v140_v28, %v139_v27  ;;  %v141_v30 = vld [vmem:[%s746_s3 + $0x50] sm:$0xff]  ;;  %v142_v31 = vld [vmem:[%s746_s3 + $0x58] sm:$0xff]  ;;  %v143_v33 = vld [vmem:[%s746_s3 + $0x60] sm:$0xff] }
  0x1a   :  { %466 = vmatpush3.bf16.msra.mxu0 %v465_v7  ;;  %v489_v32 = vpack.c.bf16 %v142_v31, %v141_v30  ;;  %v144_v34 = vld [vmem:[%s746_s3 + $0x68] sm:$0xff]  ;;  %v145_v36 = vld [vmem:[%s746_s3 + $0x70] sm:$0xff]  ;;  %v146_v37 = vld [vmem:[%s746_s3 + $0x78] sm:$0xff] }
  0x1b   :  { %467 = vmatprep.subr.bf16.mxu0 %v554_v0  ;;  %478 = vmatpush3.bf16.msra.mxu1 %v477_v15  ;;  %v492_v35 = vpack.c.bf16 %v144_v34, %v143_v33  ;;  %v495_v38 = vpack.c.bf16 %v146_v37, %v145_v36  ;;  %v225_v39 = vld [vmem:[%s748_s5] sm:$0xff]  ;;  %v226_v40 = vld [vmem:[%s748_s5 + $0x8] sm:$0xff]  ;;  %v227_v41 = vld [vmem:[%s748_s5 + $0x10] sm:$0xff] }
  0x1c   :  { %479 = vmatprep.subr.bf16.mxu1 %v554_v0  ;;  %v498_v42 = vpack.c.bf16 %v226_v40, %v225_v39  ;;  %v228_v43 = vld [vmem:[%s748_s5 + $0x18] sm:$0xff]  ;;  %v229_v45 = vld [vmem:[%s748_s5 + $0x20] sm:$0xff]  ;;  %v230_v46 = vld [vmem:[%s748_s5 + $0x28] sm:$0xff] }
  0x1d   :  { %v501_v44 = vpack.c.bf16 %v228_v43, %v227_v41  ;;  %v504_v47 = vpack.c.bf16 %v230_v46, %v229_v45  ;;  %v231_v48 = vld [vmem:[%s748_s5 + $0x30] sm:$0xff]  ;;  %v232_v49 = vld [vmem:[%s748_s5 + $0x38] sm:$0xff]  ;;  %v233_v51 = vld [vmem:[%s748_s5 + $0x40] sm:$0xff] }
  0x1e   :  { %469 = vmatpush3.bf16.msra.mxu0 %v468_v16  ;;  %v507_v50 = vpack.c.bf16 %v232_v49, %v231_v48  ;;  %v234_v52 = vld [vmem:[%s748_s5 + $0x48] sm:$0xff]  ;;  %v235_v54 = vld [vmem:[%s748_s5 + $0x50] sm:$0xff]  ;;  %v236_v55 = vld [vmem:[%s748_s5 + $0x58] sm:$0xff] }
  0x1f   :  { %470 = vmatprep.subr.bf16.mxu0 %v554_v0  ;;  %481 = vmatpush3.bf16.msra.mxu1 %v480_v21  ;;  %v510_v53 = vpack.c.bf16 %v234_v52, %v233_v51  ;;  %v513_v56 = vpack.c.bf16 %v236_v55, %v235_v54  ;;  %v237_v57 = vld [vmem:[%s748_s5 + $0x60] sm:$0xff]  ;;  %v238_v58 = vld [vmem:[%s748_s5 + $0x68] sm:$0xff]  ;;  %v239_v2 = vld [vmem:[%s748_s5 + $0x70] sm:$0xff] }
  0x20   :  { %482 = vmatprep.subr.bf16.mxu1 %v554_v0  ;;  %v516_v59 = vpack.c.bf16 %v238_v58, %v237_v57  ;;  %v325_v60 = vld [vmem:[%s745_s2] ss:$0 sm:$0xff]  ;;  %v240_v3 = vld [vmem:[%s748_s5 + $0x78] sm:$0xff] }
  0x21   :  { %v519_v4 = vpack.c.bf16 %v240_v3, %v239_v2  ;;  %v328_v9 = vld [vmem:[%s749_s6] ss:$0 sm:$0xff] }
  0x22   :  { %472 = vmatpush3.bf16.msra.mxu0 %v471_v22 }
  0x23   :  { %497 = vmatprep.subr.bf16.mxu0 %v554_v0  ;;  %484 = vmatpush3.bf16.msra.mxu1 %v483_v25 }
  0x24   :  { %485 = vmatprep.subr.bf16.mxu1 %v554_v0 }
  0x25   :  { %389 = vmatmul.mubr.msk.f32.vlgmr.msra.gmra.mrb[0].mxu0 %vm56_vm1, %v40_v26 }
  0x26   :  { %458 = vmatprep.mubr.msk.f32.mxu0 %vm555_vm0, %v556_v1  ;;  %499 = vmatpush3.bf16.msra.mxu0 %v498_v42 }
  0x27   :  { %487 = vmatpush3.bf16.msra.mxu1 %v486_v29  ;;  %500 = vmatprep.subr.bf16.mxu0 %v554_v0 }
  0x28   :  { %488 = vmatprep.subr.bf16.mxu1 %v554_v0 }
  0x2a   :  { %502 = vmatpush3.bf16.msra.mxu0 %v501_v44 }
  0x2b   :  { %490 = vmatpush3.bf16.msra.mxu1 %v489_v32  ;;  %503 = vmatprep.subr.bf16.mxu0 %v554_v0 }
  0x2c   :  { %491 = vmatprep.subr.bf16.mxu1 %v554_v0 }
  0x2e   :  { %505 = vmatpush3.bf16.msra.mxu0 %v504_v47 }
  0x2f   :  { %493 = vmatpush3.bf16.msra.mxu1 %v492_v35  ;;  %506 = vmatprep.subr.bf16.mxu0 %v554_v0 }
  0x30   :  { %494 = vmatprep.subr.bf16.mxu1 %v554_v0 }
  0x32   :  { %508 = vmatpush3.bf16.msra.mxu0 %v507_v50 }
  0x33   :  { %496 = vmatpush3.bf16.msra.mxu1 %v495_v38  ;;  %509 = vmatprep.subr.bf16.mxu0 %v554_v0 }
  0x36   :  { %511 = vmatpush3.bf16.msra.mxu0 %v510_v53 }
  0x37   :  { %512 = vmatprep.subr.bf16.mxu0 %v554_v0 }
  0x3a   :  { %514 = vmatpush3.bf16.msra.mxu0 %v513_v56 }
  0x3b   :  { %515 = vmatprep.subr.bf16.mxu0 %v554_v0 }
  0x3e   :  { %517 = vmatpush3.bf16.msra.mxu0 %v516_v59 }
  0x3f   :  { %518 = vmatprep.subr.bf16.mxu0 %v554_v0  ;;  %v327_v0 = vld [vmem:[%s747_s4] ss:$0 sm:$0xff] }
  0x42   :  { %520 = vmatpush3.bf16.msra.mxu0 %v519_v4 }
  0xf8   :  { %v126_v61 = vpop.f32.mrb[0].mxu0 }
  0xf9   :  { %v127_v62 = vadd.f32 %v325_v60, %v126_v61  ;;  %v390_v63 = vpop.f32.mrb[1].mxu0 }
  0xfb   :  { %v130_v1 = vmax.f32 %v127_v62, 0.0 }
  0xfd   :  { %424 = vmatmul.mubr.f32.vlgmr.msra.gmra.mrb[0].mxu1 %v130_v1 }
 0x1d0   :  { %v220_v5 = vpop.f32.mrb[0].mxu1 }
 0x1d1   :  { %v221_v6 = vadd.f32 %v327_v0, %v220_v5  ;;  %v425_v7 = vpop.f32.mrb[1].mxu1 }
 0x1d3   :  { %v224_v8 = vmax.f32 %v221_v6, 0.0 }
 0x1d5   :  { %459 = vmatmul.mubr.f32.vlgmr.msra.gmra.mrb[2].mxu0 %v224_v8 }
 0x2a8   :  { %v314_v10 = vpop.f32.mrb[2].mxu0 }
 0x2a9   :  { %v315_v11 = vadd.f32 %v328_v9, %v314_v10  ;;  %v460_v12 = vpop.f32.mrb[3].mxu0 }
 0x2ab   :  { %319 = vst.msk [vmem:[%s750_s7] sm:$0xff] %vm318_vm2, %v315_v11 }
 0x2ac   :  { %324 = vsyncpa [#allocation3], 1 }

</bundles_post_ra>
